<compile_context>
chip_gen: v7x
topology: tpu7x:2x2x1
jax: 0.10.0
libtpu: 0.0.40
codegen_flags: <defaults>
</compile_context>

<pallas_src>
import jax
import jax.numpy as jnp
from jax.experimental import pallas as pl
from jax.experimental.pallas import tpu as pltpu

LAYER_NORM_EPS = 1e-12
_INV_SQRT2 = 0.7071067811865476  # 1/sqrt(2), hoisted constant


def _gelu_exact(x):
    # Exact (erf-based) GELU, matching transformers' default "gelu" activation.
    # TODO(synk): optionally evaluate on bf16 (2x packed VPU) or switch to tanh-approx
    # (EUP slot) on v6e/v7x once exact-erf parity with HF is confirmed non-critical.
    return 0.5 * x * (1.0 + jax.lax.erf(x * _INV_SQRT2))


def _make_kernel(TI, NI):
    """Kernel factory: TI = intermediate-dim chunk width, NI = number of chunks."""

    def kernel(x_ref, w1_ref, b1_ref, w2_ref, b2_ref, gamma_ref, beta_ref, o_ref):
        x = x_ref[...]                                   # [TM, H] f32 (kept for residual)
        x_bf = x.astype(jnp.bfloat16)
        tm_blk, h_dim = x_ref.shape

        def chunk(off, acc):
            # ---- Intermediate dense chunk: bf16 x bf16 -> f32 on the MXU ----
            h = jnp.dot(x_bf, w1_ref[:, pl.ds(off, TI)],
                        preferred_element_type=jnp.float32)          # [TM, TI]
            h = _gelu_exact(h + b1_ref[:, pl.ds(off, TI)])
            # ---- Output dense chunk, accumulated in f32 ----
            return acc + jnp.dot(h.astype(jnp.bfloat16),
                                 w2_ref[pl.ds(off, TI), :],
                                 preferred_element_type=jnp.float32)  # [TM, H]

        acc0 = jnp.zeros((tm_blk, h_dim), jnp.float32)
        if NI == 1:
            acc = chunk(0, acc0)
        else:
            def body(k, acc):
                return chunk(pl.multiple_of(k * TI, TI), acc)
            acc = jax.lax.fori_loop(0, NI, body, acc0, unroll=2)

        # ---- Bias + residual + LayerNorm (last dim, biased variance, eps=1e-12) ----
        y = acc + b2_ref[...] + x
        mean = jnp.mean(y, axis=-1, keepdims=True)
        var = jnp.mean(jnp.square(y - mean), axis=-1, keepdims=True)
        y = (y - mean) * jax.lax.rsqrt(var + LAYER_NORM_EPS)
        o_ref[...] = (y * gamma_ref[...] + beta_ref[...]).astype(o_ref.dtype)

    return kernel


def _pick_row_tile(M, tm_max, align):
    """Largest TM <= tm_max dividing M (preferring MXU-aligned multiples); else pad."""
    if M <= tm_max:
        return M, False
    for step in (align, 8):
        t = (tm_max // step) * step
        while t >= step:
            if M % t == 0:
                return t, False
            t -= step
    t = (tm_max // align) * align
    if t == 0:
        t = ((min(tm_max, M) + 7) // 8) * 8
    return t, True


def _pick_intermediate_chunk(I):
    """Chunk width for the intermediate dim (lane-aligned, divides I)."""
    if I <= 512:
        return I
    for cand in (512, 384, 256, 128):
        if I % cand == 0:
            return cand
    return I  # no clean divisor -> single chunk (old behaviour)


def bert_feed_forward(hidden_states, w1, b1, w2, b2, gamma, beta):
    """hidden_states: [B, S, H] float32; w1: [H, I], w2: [I, H] in (in, out) layout."""
    B, S, H = hidden_states.shape
    I = w1.shape[1]
    M = B * S

    # ---- pick tile sizes / VMEM budget per TPU generation ----
    try:
        kind = jax.devices()[0].device_kind.lower()
    except Exception:
        kind = ""
    is_v7 = "v7" in kind
    is_v5 = "v5" in kind

    align = 128 if is_v5 else 256        # MXU: 4x128^2 on v5e, 2x256^2 on v6e/v7x
    tm_max = 512 if is_v7 else 1024      # v7x: 64 MiB VMEM/TC; v5e/v6e: 128 MiB

    TM, needs_pad = _pick_row_tile(M, tm_max, align)
    # v7x has 2 TensorCores: keep the tile count even so neither core idles.
    if is_v7 and not needs_pad and (M // TM) % 2 == 1 and TM % 16 == 0:
        TM //= 2

    TI = _pick_intermediate_chunk(I)
    NI = I // TI

    x2d = hidden_states.reshape(M, H)
    if needs_pad:
        M_pad = -(-M // TM) * TM
        x2d = jnp.pad(x2d, ((0, M_pad - M), (0, 0)))
    else:
        M_pad = M
    num_tiles = M_pad // TM

    # bf16 weights for the MXU; biases / LN params stay f32 (broadcast as 2D rows).
    w1b = w1.astype(jnp.bfloat16)
    w2b = w2.astype(jnp.bfloat16)
    b1r = b1.reshape(1, I).astype(jnp.float32)
    b2r = b2.reshape(1, H).astype(jnp.float32)
    gr = gamma.reshape(1, H).astype(jnp.float32)
    br = beta.reshape(1, H).astype(jnp.float32)

    # VMEM budget: single-buffered resident weights, double-buffered x/out tiles,
    # chunked f32 GELU intermediate, f32 accumulator, plus Mosaic scratch headroom.
    vmem_bytes = (
        4 * H * I                      # w1 + w2, bf16, single-buffered (Buffered(1))
        + 2 * 2 * TM * H * 4           # x + out tiles, f32, x2 pipeline buffers
        + 3 * TM * TI * 4              # chunked f32 GELU intermediate (+ bf16 copy)
        + TM * H * 4                   # f32 accumulator carry
        + (8 << 20)                    # headroom for Mosaic internal scratch
    )
    vmem_bytes = int(min(max(vmem_bytes, 16 << 20),
                         (56 << 20) if is_v7 else (100 << 20)))

    cost = pl.CostEstimate(
        flops=4 * M * H * I,                                   # two dense layers
        transcendentals=M * I,                                 # erf per intermediate elem
        bytes_accessed=2 * M * H * 4 + 4 * H * I + 4 * (I + 3 * H),
    )

    kernel = _make_kernel(TI, NI)

    def run(single_buffer_weights):
        pm = {"pipeline_mode": pl.Buffered(1)} if single_buffer_weights else {}
        tile_spec = lambda: pl.BlockSpec((TM, H), lambda i: (i, 0))      # pipelined over M
        resident = lambda shape: pl.BlockSpec(shape, lambda i: (0, 0), **pm)
        return pl.pallas_call(
            kernel,
            out_shape=jax.ShapeDtypeStruct((M_pad, H), hidden_states.dtype),
            grid=(num_tiles,),
            in_specs=[
                tile_spec(),            # x     [TM, H]
                resident((H, I)),       # w1    (bf16, VMEM-resident)
                resident((1, I)),       # b1
                resident((I, H)),       # w2    (bf16, VMEM-resident)
                resident((1, H)),       # b2
                resident((1, H)),       # gamma
                resident((1, H)),       # beta
            ],
            out_specs=tile_spec(),
            compiler_params=pltpu.CompilerParams(
                dimension_semantics=("parallel",),   # shard row tiles across TCs on v7x
                vmem_limit_bytes=vmem_bytes,
            ),
            cost_estimate=cost,
        )(x2d, w1b, b1r, w2b, b2r, gr, br)

    try:
        out = run(True)
    except Exception:
        # TODO(synk): pl.Buffered(1) rejected by this jax/Mosaic version; fall back to
        # default double-buffering of the resident weight blocks (correctness identical).
        out = run(False)

    if M_pad != M:
        out = out[:M]
    return out.reshape(B, S, H)


def _reference(hidden_states, w1, b1, w2, b2, gamma, beta):
    x = hidden_states.astype(jnp.float32)
    h = _gelu_exact(x @ w1 + b1)
    y = h @ w2 + b2 + x
    mean = jnp.mean(y, axis=-1, keepdims=True)
    var = jnp.mean((y - mean) ** 2, axis=-1, keepdims=True)
    y = (y - mean) * jax.lax.rsqrt(var + LAYER_NORM_EPS)
    return y * gamma + beta


if __name__ == "__main__":
    # Small BERT-like config: hidden=32, intermediate=128, batch=2, seq=8.
    B, S, H, I = 2, 8, 32, 128

    key = jax.random.PRNGKey(0)
    k_x, k_w1, k_b1, k_w2, k_b2, k_g, k_be = jax.random.split(key, 7)

    hidden_states = jax.random.normal(k_x, (B, S, H), dtype=jnp.float32)
    # Deterministic parameter init (scaled normals, synthetic — not a checkpoint).
    w1 = jax.random.normal(k_w1, (H, I), dtype=jnp.float32) * 0.02      # (in, out)
    b1 = jax.random.normal(k_b1, (I,), dtype=jnp.float32) * 0.02
    w2 = jax.random.normal(k_w2, (I, H), dtype=jnp.float32) * 0.02      # (in, out)
    b2 = jax.random.normal(k_b2, (H,), dtype=jnp.float32) * 0.02
    gamma = 1.0 + 0.1 * jax.random.normal(k_g, (H,), dtype=jnp.float32)
    beta = 0.02 * jax.random.normal(k_be, (H,), dtype=jnp.float32)

    out = bert_feed_forward(hidden_states, w1, b1, w2, b2, gamma, beta)
    out = jax.block_until_ready(out)

    ref = _reference(hidden_states, w1, b1, w2, b2, gamma, beta)
    assert out.shape == (B, S, H)
    # bf16 MXU operands (f32 accumulation) vs a pure-f32 reference: loosened tolerance.
    assert jnp.allclose(out, ref, atol=2e-3, rtol=2e-3), "mismatch vs reference"

    print("KERNEL_OK")
</pallas_src>

<mosaic_0001>
module attributes {stable_mosaic.version = 11 : i64} {
  func.func @kernel(%arg0: i32, %arg1: memref<16x32xf32, #tpu.memory_space<vmem>>, %arg2: memref<32x128xbf16, #tpu.memory_space<vmem>>, %arg3: memref<1x128xf32, #tpu.memory_space<vmem>>, %arg4: memref<128x32xbf16, #tpu.memory_space<vmem>>, %arg5: memref<1x32xf32, #tpu.memory_space<vmem>>, %arg6: memref<1x32xf32, #tpu.memory_space<vmem>>, %arg7: memref<1x32xf32, #tpu.memory_space<vmem>>, %arg8: memref<16x32xf32, #tpu.memory_space<vmem>>) attributes {dimension_semantics = [#tpu.dimension_semantics<parallel>], iteration_bounds = array<i64: 1>, scalar_prefetch = 0 : i64, scratch_operands = 0 : i64, tpu.core_type = #tpu.core_type<tc>, window_params = [{transform_indices = @transform_0, window_bounds = array<i64: 16, 32>}, {pipeline_mode = #tpu.pipeline_mode<synchronous>, transform_indices = @transform_1, window_bounds = array<i64: 32, 128>}, {pipeline_mode = #tpu.pipeline_mode<synchronous>, transform_indices = @transform_2, window_bounds = array<i64: 1, 128>}, {pipeline_mode = #tpu.pipeline_mode<synchronous>, transform_indices = @transform_3, window_bounds = array<i64: 128, 32>}, {pipeline_mode = #tpu.pipeline_mode<synchronous>, transform_indices = @transform_4, window_bounds = array<i64: 1, 32>}, {pipeline_mode = #tpu.pipeline_mode<synchronous>, transform_indices = @transform_5, window_bounds = array<i64: 1, 32>}, {pipeline_mode = #tpu.pipeline_mode<synchronous>, transform_indices = @transform_6, window_bounds = array<i64: 1, 32>}, {transform_indices = @transform_7, window_bounds = array<i64: 16, 32>}]} {
    %c0 = arith.constant 0 : index
    %c0_0 = arith.constant 0 : index
    %0 = vector.load %arg1[%c0, %c0_0] : memref<16x32xf32, #tpu.memory_space<vmem>>, vector<16x32xf32>
    %1 = arith.truncf %0 : vector<16x32xf32> to vector<16x32xbf16>
    %cst = arith.constant 0.000000e+00 : f32
    %2 = vector.broadcast %cst : f32 to vector<16x32xf32>
    %c0_1 = arith.constant 0 : index
    %c0_2 = arith.constant 0 : index
    %3 = vector.load %arg2[%c0_1, %c0_2] : memref<32x128xbf16, #tpu.memory_space<vmem>>, vector<32x128xbf16>
    %cst_3 = arith.constant dense<0.000000e+00> : vector<16x128xf32>
    %4 = tpu.matmul %1, %3, %cst_3 {dimension_numbers = #tpu.dot_dimension_numbers<[1], [0], [0], [1], [0, 0, 1, 1], [], []>} : vector<16x32xbf16>, vector<32x128xbf16>, vector<16x128xf32> -> vector<16x128xf32>
    %c0_4 = arith.constant 0 : index
    %c0_5 = arith.constant 0 : index
    %5 = vector.load %arg3[%c0_4, %c0_5] : memref<1x128xf32, #tpu.memory_space<vmem>>, vector<1x128xf32>
    %6 = vector.broadcast %5 : vector<1x128xf32> to vector<16x128xf32>
    %7 = arith.addf %4, %6 : vector<16x128xf32>
    %cst_6 = arith.constant 5.000000e-01 : f32
    %8 = vector.broadcast %cst_6 : f32 to vector<16x128xf32>
    %9 = arith.mulf %8, %7 : vector<16x128xf32>
    %cst_7 = arith.constant 0.707106769 : f32
    %10 = vector.broadcast %cst_7 : f32 to vector<16x128xf32>
    %11 = arith.mulf %7, %10 : vector<16x128xf32>
    %12 = math.erf %11 : vector<16x128xf32>
    %cst_8 = arith.constant 1.000000e+00 : f32
    %13 = vector.broadcast %cst_8 : f32 to vector<16x128xf32>
    %14 = arith.addf %13, %12 : vector<16x128xf32>
    %15 = arith.mulf %9, %14 : vector<16x128xf32>
    %16 = arith.truncf %15 : vector<16x128xf32> to vector<16x128xbf16>
    %c0_9 = arith.constant 0 : index
    %c0_10 = arith.constant 0 : index
    %17 = vector.load %arg4[%c0_9, %c0_10] : memref<128x32xbf16, #tpu.memory_space<vmem>>, vector<128x32xbf16>
    %cst_11 = arith.constant dense<0.000000e+00> : vector<16x32xf32>
    %18 = tpu.matmul %16, %17, %cst_11 {dimension_numbers = #tpu.dot_dimension_numbers<[1], [0], [0], [1], [0, 0, 1, 1], [], []>} : vector<16x128xbf16>, vector<128x32xbf16>, vector<16x32xf32> -> vector<16x32xf32>
    %19 = arith.addf %2, %18 : vector<16x32xf32>
    %c0_12 = arith.constant 0 : index
    %c0_13 = arith.constant 0 : index
    %20 = vector.load %arg5[%c0_12, %c0_13] : memref<1x32xf32, #tpu.memory_space<vmem>>, vector<1x32xf32>
    %21 = vector.broadcast %20 : vector<1x32xf32> to vector<16x32xf32>
    %22 = arith.addf %19, %21 : vector<16x32xf32>
    %23 = arith.addf %22, %0 : vector<16x32xf32>
    %cst_14 = arith.constant dense<0.000000e+00> : vector<16xf32>
    %24 = vector.multi_reduction <add>, %23, %cst_14 [1] : vector<16x32xf32> to vector<16xf32>
    %25 = vector.shape_cast %24 : vector<16xf32> to vector<16x1xf32>
    %cst_15 = arith.constant 3.200000e+01 : f32
    %26 = vector.broadcast %cst_15 : f32 to vector<16x1xf32>
    %27 = arith.divf %25, %26 : vector<16x1xf32>
    %28 = vector.broadcast %27 : vector<16x1xf32> to vector<16x32xf32>
    %29 = arith.subf %23, %28 : vector<16x32xf32>
    %30 = arith.mulf %29, %29 : vector<16x32xf32>
    %cst_16 = arith.constant dense<0.000000e+00> : vector<16xf32>
    %31 = vector.multi_reduction <add>, %30, %cst_16 [1] : vector<16x32xf32> to vector<16xf32>
    %32 = vector.shape_cast %31 : vector<16xf32> to vector<16x1xf32>
    %cst_17 = arith.constant 3.200000e+01 : f32
    %33 = vector.broadcast %cst_17 : f32 to vector<16x1xf32>
    %34 = arith.divf %32, %33 : vector<16x1xf32>
    %35 = vector.broadcast %27 : vector<16x1xf32> to vector<16x32xf32>
    %36 = arith.subf %23, %35 : vector<16x32xf32>
    %cst_18 = arith.constant 9.99999996E-13 : f32
    %37 = vector.broadcast %cst_18 : f32 to vector<16x1xf32>
    %38 = arith.addf %34, %37 : vector<16x1xf32>
    %39 = math.rsqrt %38 : vector<16x1xf32>
    %40 = vector.broadcast %39 : vector<16x1xf32> to vector<16x32xf32>
    %41 = arith.mulf %36, %40 : vector<16x32xf32>
    %c0_19 = arith.constant 0 : index
    %c0_20 = arith.constant 0 : index
    %42 = vector.load %arg6[%c0_19, %c0_20] : memref<1x32xf32, #tpu.memory_space<vmem>>, vector<1x32xf32>
    %43 = vector.broadcast %42 : vector<1x32xf32> to vector<16x32xf32>
    %44 = arith.mulf %41, %43 : vector<16x32xf32>
    %c0_21 = arith.constant 0 : index
    %c0_22 = arith.constant 0 : index
    %45 = vector.load %arg7[%c0_21, %c0_22] : memref<1x32xf32, #tpu.memory_space<vmem>>, vector<1x32xf32>
    %46 = vector.broadcast %45 : vector<1x32xf32> to vector<16x32xf32>
    %47 = arith.addf %44, %46 : vector<16x32xf32>
    %c0_23 = arith.constant 0 : index
    %c0_24 = arith.constant 0 : index
    %48 = vector.load %arg8[%c0_23, %c0_24] : memref<16x32xf32, #tpu.memory_space<vmem>>, vector<16x32xf32>
    tpu.vector_store %arg8[%c0_23, %c0_24], %47 {strides = array<i32>} : memref<16x32xf32, #tpu.memory_space<vmem>>, vector<16x32xf32>,
    return
  }
  func.func @transform_0(%arg0: i32) -> (i32, i32) {
    %c0_i32 = arith.constant 0 : i32
    %c0_i32_0 = arith.constant 0 : i32
    return %arg0, %c0_i32 : i32, i32
  }
  func.func @transform_1(%arg0: i32) -> (i32, i32) {
    %c0_i32 = arith.constant 0 : i32
    %c0_i32_0 = arith.constant 0 : i32
    %c0_i32_1 = arith.constant 0 : i32
    return %c0_i32, %c0_i32_0 : i32, i32
  }
  func.func @transform_2(%arg0: i32) -> (i32, i32) {
    %c0_i32 = arith.constant 0 : i32
    %c0_i32_0 = arith.constant 0 : i32
    %c0_i32_1 = arith.constant 0 : i32
    return %c0_i32, %c0_i32_0 : i32, i32
  }
  func.func @transform_3(%arg0: i32) -> (i32, i32) {
    %c0_i32 = arith.constant 0 : i32
    %c0_i32_0 = arith.constant 0 : i32
    %c0_i32_1 = arith.constant 0 : i32
    return %c0_i32, %c0_i32_0 : i32, i32
  }
  func.func @transform_4(%arg0: i32) -> (i32, i32) {
    %c0_i32 = arith.constant 0 : i32
    %c0_i32_0 = arith.constant 0 : i32
    %c0_i32_1 = arith.constant 0 : i32
    return %c0_i32, %c0_i32_0 : i32, i32
  }
  func.func @transform_5(%arg0: i32) -> (i32, i32) {
    %c0_i32 = arith.constant 0 : i32
    %c0_i32_0 = arith.constant 0 : i32
    %c0_i32_1 = arith.constant 0 : i32
    return %c0_i32, %c0_i32_0 : i32, i32
  }
  func.func @transform_6(%arg0: i32) -> (i32, i32) {
    %c0_i32 = arith.constant 0 : i32
    %c0_i32_0 = arith.constant 0 : i32
    %c0_i32_1 = arith.constant 0 : i32
    return %c0_i32, %c0_i32_0 : i32, i32
  }
  func.func @transform_7(%arg0: i32) -> (i32, i32) {
    %c0_i32 = arith.constant 0 : i32
    %c0_i32_0 = arith.constant 0 : i32
    return %arg0, %c0_i32 : i32, i32
  }
}

module attributes {stable_mosaic.version = 11 : i64} {
  func.func @kernel(%arg0: i32, %arg1: memref<16x32xf32, #tpu.memory_space<vmem>>, %arg2: memref<32x128xbf16, #tpu.memory_space<vmem>>, %arg3: memref<1x128xf32, #tpu.memory_space<vmem>>, %arg4: memref<128x32xbf16, #tpu.memory_space<vmem>>, %arg5: memref<1x32xf32, #tpu.memory_space<vmem>>, %arg6: memref<1x32xf32, #tpu.memory_space<vmem>>, %arg7: memref<1x32xf32, #tpu.memory_space<vmem>>, %arg8: memref<16x32xf32, #tpu.memory_space<vmem>>) attributes {dimension_semantics = [#tpu.dimension_semantics<parallel>], iteration_bounds = array<i64: 1>, scalar_prefetch = 0 : i64, scratch_operands = 0 : i64, tpu.core_type = #tpu.core_type<tc>, window_params = [{transform_indices = @transform_0, window_bounds = array<i64: 16, 32>}, {pipeline_mode = #tpu.pipeline_mode<synchronous>, transform_indices = @transform_1, window_bounds = array<i64: 32, 128>}, {pipeline_mode = #tpu.pipeline_mode<synchronous>, transform_indices = @transform_2, window_bounds = array<i64: 1, 128>}, {pipeline_mode = #tpu.pipeline_mode<synchronous>, transform_indices = @transform_3, window_bounds = array<i64: 128, 32>}, {pipeline_mode = #tpu.pipeline_mode<synchronous>, transform_indices = @transform_4, window_bounds = array<i64: 1, 32>}, {pipeline_mode = #tpu.pipeline_mode<synchronous>, transform_indices = @transform_5, window_bounds = array<i64: 1, 32>}, {pipeline_mode = #tpu.pipeline_mode<synchronous>, transform_indices = @transform_6, window_bounds = array<i64: 1, 32>}, {transform_indices = @transform_7, window_bounds = array<i64: 16, 32>}]} {
    %c0 = arith.constant 0 : index
    %c0_0 = arith.constant 0 : index
    %0 = vector.load %arg1[%c0, %c0_0] : memref<16x32xf32, #tpu.memory_space<vmem>>, vector<16x32xf32>
    %1 = arith.truncf %0 : vector<16x32xf32> to vector<16x32xbf16>
    %cst = arith.constant 0.000000e+00 : f32
    %2 = vector.broadcast %cst : f32 to vector<16x32xf32>
    %c0_1 = arith.constant 0 : index
    %c0_2 = arith.constant 0 : index
    %3 = vector.load %arg2[%c0_1, %c0_2] : memref<32x128xbf16, #tpu.memory_space<vmem>>, vector<32x128xbf16>
    %cst_3 = arith.constant dense<0.000000e+00> : vector<16x128xf32>
    %4 = tpu.matmul %1, %3, %cst_3 {dimension_numbers = #tpu.dot_dimension_numbers<[1], [0], [0], [1], [0, 0, 1, 1], [], []>} : vector<16x32xbf16>, vector<32x128xbf16>, vector<16x128xf32> -> vector<16x128xf32>
    %c0_4 = arith.constant 0 : index
    %c0_5 = arith.constant 0 : index
    %5 = vector.load %arg3[%c0_4, %c0_5] : memref<1x128xf32, #tpu.memory_space<vmem>>, vector<1x128xf32>
    %6 = vector.broadcast %5 : vector<1x128xf32> to vector<16x128xf32>
    %7 = arith.addf %4, %6 : vector<16x128xf32>
    %cst_6 = arith.constant 5.000000e-01 : f32
    %8 = vector.broadcast %cst_6 : f32 to vector<16x128xf32>
    %9 = arith.mulf %8, %7 : vector<16x128xf32>
    %cst_7 = arith.constant 0.707106769 : f32
    %10 = vector.broadcast %cst_7 : f32 to vector<16x128xf32>
    %11 = arith.mulf %7, %10 : vector<16x128xf32>
    %12 = math.erf %11 : vector<16x128xf32>
    %cst_8 = arith.constant 1.000000e+00 : f32
    %13 = vector.broadcast %cst_8 : f32 to vector<16x128xf32>
    %14 = arith.addf %13, %12 : vector<16x128xf32>
    %15 = arith.mulf %9, %14 : vector<16x128xf32>
    %16 = arith.truncf %15 : vector<16x128xf32> to vector<16x128xbf16>
    %c0_9 = arith.constant 0 : index
    %c0_10 = arith.constant 0 : index
    %17 = vector.load %arg4[%c0_9, %c0_10] : memref<128x32xbf16, #tpu.memory_space<vmem>>, vector<128x32xbf16>
    %cst_11 = arith.constant dense<0.000000e+00> : vector<16x32xf32>
    %18 = tpu.matmul %16, %17, %cst_11 {dimension_numbers = #tpu.dot_dimension_numbers<[1], [0], [0], [1], [0, 0, 1, 1], [], []>} : vector<16x128xbf16>, vector<128x32xbf16>, vector<16x32xf32> -> vector<16x32xf32>
    %19 = arith.addf %2, %18 : vector<16x32xf32>
    %c0_12 = arith.constant 0 : index
    %c0_13 = arith.constant 0 : index
    %20 = vector.load %arg5[%c0_12, %c0_13] : memref<1x32xf32, #tpu.memory_space<vmem>>, vector<1x32xf32>
    %21 = vector.broadcast %20 : vector<1x32xf32> to vector<16x32xf32>
    %22 = arith.addf %19, %21 : vector<16x32xf32>
    %23 = arith.addf %22, %0 : vector<16x32xf32>
    %cst_14 = arith.constant dense<0.000000e+00> : vector<16xf32>
    %24 = vector.multi_reduction <add>, %23, %cst_14 [1] : vector<16x32xf32> to vector<16xf32>
    %25 = vector.shape_cast %24 : vector<16xf32> to vector<16x1xf32>
    %cst_15 = arith.constant 3.200000e+01 : f32
    %26 = vector.broadcast %cst_15 : f32 to vector<16x1xf32>
    %27 = arith.divf %25, %26 : vector<16x1xf32>
    %28 = vector.broadcast %27 : vector<16x1xf32> to vector<16x32xf32>
    %29 = arith.subf %23, %28 : vector<16x32xf32>
    %30 = arith.mulf %29, %29 : vector<16x32xf32>
    %cst_16 = arith.constant dense<0.000000e+00> : vector<16xf32>
    %31 = vector.multi_reduction <add>, %30, %cst_16 [1] : vector<16x32xf32> to vector<16xf32>
    %32 = vector.shape_cast %31 : vector<16xf32> to vector<16x1xf32>
    %cst_17 = arith.constant 3.200000e+01 : f32
    %33 = vector.broadcast %cst_17 : f32 to vector<16x1xf32>
    %34 = arith.divf %32, %33 : vector<16x1xf32>
    %35 = vector.broadcast %27 : vector<16x1xf32> to vector<16x32xf32>
    %36 = arith.subf %23, %35 : vector<16x32xf32>
    %cst_18 = arith.constant 9.99999996E-13 : f32
    %37 = vector.broadcast %cst_18 : f32 to vector<16x1xf32>
    %38 = arith.addf %34, %37 : vector<16x1xf32>
    %39 = math.rsqrt %38 : vector<16x1xf32>
    %40 = vector.broadcast %39 : vector<16x1xf32> to vector<16x32xf32>
    %41 = arith.mulf %36, %40 : vector<16x32xf32>
    %c0_19 = arith.constant 0 : index
    %c0_20 = arith.constant 0 : index
    %42 = vector.load %arg6[%c0_19, %c0_20] : memref<1x32xf32, #tpu.memory_space<vmem>>, vector<1x32xf32>
    %43 = vector.broadcast %42 : vector<1x32xf32> to vector<16x32xf32>
    %44 = arith.mulf %41, %43 : vector<16x32xf32>
    %c0_21 = arith.constant 0 : index
    %c0_22 = arith.constant 0 : index
    %45 = vector.load %arg7[%c0_21, %c0_22] : memref<1x32xf32, #tpu.memory_space<vmem>>, vector<1x32xf32>
    %46 = vector.broadcast %45 : vector<1x32xf32> to vector<16x32xf32>
    %47 = arith.addf %44, %46 : vector<16x32xf32>
    %c0_23 = arith.constant 0 : index
    %c0_24 = arith.constant 0 : index
    %48 = vector.load %arg8[%c0_23, %c0_24] : memref<16x32xf32, #tpu.memory_space<vmem>>, vector<16x32xf32>
    tpu.vector_store %arg8[%c0_23, %c0_24], %47 {strides = array<i32>} : memref<16x32xf32, #tpu.memory_space<vmem>>, vector<16x32xf32>,
    return
  }
  func.func @transform_0(%arg0: i32) -> (i32, i32) {
    %c0_i32 = arith.constant 0 : i32
    %c0_i32_0 = arith.constant 0 : i32
    return %arg0, %c0_i32 : i32, i32
  }
  func.func @transform_1(%arg0: i32) -> (i32, i32) {
    %c0_i32 = arith.constant 0 : i32
    %c0_i32_0 = arith.constant 0 : i32
    %c0_i32_1 = arith.constant 0 : i32
    return %c0_i32, %c0_i32_0 : i32, i32
  }
  func.func @transform_2(%arg0: i32) -> (i32, i32) {
    %c0_i32 = arith.constant 0 : i32
    %c0_i32_0 = arith.constant 0 : i32
    %c0_i32_1 = arith.constant 0 : i32
    return %c0_i32, %c0_i32_0 : i32, i32
  }
  func.func @transform_3(%arg0: i32) -> (i32, i32) {
    %c0_i32 = arith.constant 0 : i32
    %c0_i32_0 = arith.constant 0 : i32
    %c0_i32_1 = arith.constant 0 : i32
    return %c0_i32, %c0_i32_0 : i32, i32
  }
  func.func @transform_4(%arg0: i32) -> (i32, i32) {
    %c0_i32 = arith.constant 0 : i32
    %c0_i32_0 = arith.constant 0 : i32
    %c0_i32_1 = arith.constant 0 : i32
    return %c0_i32, %c0_i32_0 : i32, i32
  }
  func.func @transform_5(%arg0: i32) -> (i32, i32) {
    %c0_i32 = arith.constant 0 : i32
    %c0_i32_0 = arith.constant 0 : i32
    %c0_i32_1 = arith.constant 0 : i32
    return %c0_i32, %c0_i32_0 : i32, i32
  }
  func.func @transform_6(%arg0: i32) -> (i32, i32) {
    %c0_i32 = arith.constant 0 : i32
    %c0_i32_0 = arith.constant 0 : i32
    %c0_i32_1 = arith.constant 0 : i32
    return %c0_i32, %c0_i32_0 : i32, i32
  }
  func.func @transform_7(%arg0: i32) -> (i32, i32) {
    %c0_i32 = arith.constant 0 : i32
    %c0_i32_0 = arith.constant 0 : i32
    return %arg0, %c0_i32 : i32, i32
  }
}

</mosaic_0001>

<bundles_post_ra>
// kernel: tpu_custom_call.1
= control target key start
LH: loop header
LB: loop body
LE: loop exit
PB: predicated region body
PF: predicated region fallthrough
CT: control target
= control target key end

     0   :  { %v389_v1 = vmov 0.0   ;;  %vm390_vm0 = vmmov 0   ;;  %vm54_vm1 = vcmask 261120   ;;  %s501_s0 = inlined_call_operand.vmem [shape: f32[16,32], index: 0, kind: input, shape index: {}]   ;;  %s502_s1 = inlined_call_operand.vmem [shape: bf16[32,128], index: 1, kind: input, shape index: {}]   ;;  %s503_s2 = inlined_call_operand.vmem [shape: f32[1,128], index: 2, kind: input, shape index: {}]   ;;  %s504_s3 = inlined_call_operand.vmem [shape: bf16[128,32], index: 3, kind: input, shape index: {}]   ;;  %s505_s4 = inlined_call_operand.vmem [shape: f32[1,32], index: 4, kind: input, shape index: {}]   ;;  %s506_s5 = inlined_call_operand.vmem [shape: f32[1,32], index: 5, kind: input, shape index: {}]   ;;  %s507_s6 = inlined_call_operand.vmem [shape: f32[1,32], index: 6, kind: input, shape index: {}]   ;;  %s508_s7 = inlined_call_operand.hbm [shape: f32[16,32], index: 7, kind: output, shape index: {}]  }
   0x1   :  { %v347_v0 = vld [vmem:[%s502_s1] sm:$0xff]   ;;  %314 = vmatprep.subr.bf16.mxu0 %v389_v1  ;;  %v348_v2 = vld [vmem:[%s502_s1 + $0x8] sm:$0xff]   ;;  %322 = vmatprep.subr.bf16.mxu1 %v389_v1 }
   0x2   :  { %315 = vmatpush3.bf16.msra.mxu0 %v347_v0  ;;  %318 = vmatprep.mubr.msk.bf16.mxu0 %vm390_vm0, %v389_v1  ;;  %v28_v3 = vld [vmem:[%s501_s0] sm:$0xff]  ;;  %v29_v4 = vld [vmem:[%s501_s0 + $0x8] sm:$0xff] }
   0x3   :  { %316 = vmatprep.subr.bf16.mxu0 %v389_v1  ;;  %v349_v5 = vld [vmem:[%s504_s3] sm:$0xff]   ;;  %338 = vmatprep.mubr.msk.bf16.mxu1 %vm390_vm0, %v389_v1  ;;  %v350_v6 = vld [vmem:[%s504_s3 + $0x8] sm:$0xff]   ;;  %v30_v7 = vpack.c.bf16 %v29_v4, %v28_v3 }
   0x4   :  { %323 = vmatpush3.bf16.msra.mxu1 %v349_v5 }
   0x5   :  { %324 = vmatprep.subr.bf16.mxu1 %v389_v1 }
   0x6   :  { %317 = vmatpush3.bf16.msra.mxu0 %v348_v2 }
   0x8   :  { %325 = vmatpush3.bf16.msra.mxu1 %v350_v6 }
   0x9   :  { %319 = vmatmul.mubr.msk.bf16.vlgmr.msra.gmra.mrb[0].mxu0 %vm54_vm1, %v30_v7 }
   0xa   :  { %12 = vsyncpa [#allocation3], 0  ;;  %326 = vmatprep.subr.bf16.mxu1 %v389_v1  ;;  %v351_v8 = vld [vmem:[%s504_s3 + $0x10] sm:$0xff]   ;;  %v352_v9 = vld [vmem:[%s504_s3 + $0x18] sm:$0xff]   ;;  %s391_s28 = smov [#allocation2]  }
   0xb   :  { %v353_v10 = vld [vmem:[%s504_s3 + $0x20] sm:$0xff]   ;;  %v354_v11 = vld [vmem:[%s504_s3 + $0x28] sm:$0xff]   ;;  %v355_v12 = vld [vmem:[%s504_s3 + $0x30] sm:$0xff]   ;;  %s276_s29 = sshll.u32 %s391_s28, 4  ;;  %s277_s29 = int_to_ptr.vmem [resolvable:$true] %s276_s29 }
   0xc   :  { %327 = vmatpush3.bf16.msra.mxu1 %v351_v8  ;;  %v356_v13 = vld [vmem:[%s504_s3 + $0x38] sm:$0xff]   ;;  %v287_v14 = vld [vmem:[%s503_s2] ss:$0 sm:$0xff]  ;;  %s365_s30 = scalar_lea.vmem %s277_s29, 256  ;;  %p370_p1 = scmp.lt.s32.totalorder %s277_s29, %s277_s29 }
   0xd   :  { %328 = vmatprep.subr.bf16.mxu1 %v389_v1  ;;  %v291_v32 = vld [vmem:[%s505_s4] ss:$0 sm:$0xff]  ;;  %p366_p0 = scmp.ne.s32.totalorder %s277_s29, %s365_s30  ;;  %p371_p2 = scmp.lt.s32.totalorder %s365_s30, %s365_s30 }
   0xe   :  { %v300_v60 = vld [vmem:[%s506_s5] ss:$0 sm:$0xff] }
   0xf   :  { %v301_v62 = vld [vmem:[%s507_s6] ss:$0 sm:$0xff]  ;;  %p372_p3 = por %p371_p2, %p370_p1 }
  0x10   :  { %329 = vmatpush3.bf16.msra.mxu1 %v352_v9 }
  0x11   :  { %330 = vmatprep.subr.bf16.mxu1 %v389_v1  ;;  %p373_p4 = pnand %p372_p3, %p366_p0 }
  0x14   :  { %331 = vmatpush3.bf16.msra.mxu1 %v353_v10 }
  0x15   :  { %332 = vmatprep.subr.bf16.mxu1 %v389_v1 }
  0x18   :  { %333 = vmatpush3.bf16.msra.mxu1 %v354_v11 }
  0x19   :  { %334 = vmatprep.subr.bf16.mxu1 %v389_v1 }
  0x1c   :  { %335 = vmatpush3.bf16.msra.mxu1 %v355_v12 }
  0x1d   :  { %336 = vmatprep.subr.bf16.mxu1 %v389_v1 }
  0x20   :  { %337 = vmatpush3.bf16.msra.mxu1 %v356_v13 }
  0xdc   :  { %v92_v15 = vpop.f32.mrb[0].mxu0 }
  0xdd   :  { %v93_v16 = vadd.f32 %v287_v14, %v92_v15  ;;  %v320_v17 = vpop.f32.mrb[1].mxu0 }
  0xde   :  { %v95_v18 = vpop.f32.mrb[2].mxu0 }
  0xdf   :  { %v101_v19 = vmul.f32 0.70710677, %v93_v16  ;;  %v96_v20 = vadd.f32 %v287_v14, %v95_v18  ;;  %v321_v21 = vpop.f32.mrb[3].mxu0  ;;  %v99_v26 = vmul.f32 0.5, %v93_v16 }
  0xe1   :  { %357 = verf.f32 %v101_v19  ;;  %v102_v22 = vmul.f32 0.70710677, %v96_v20  ;;  %v100_v27 = vmul.f32 0.5, %v96_v20 }
  0xe3   :  { %359 = verf.f32 %v102_v22 }
  0xeb   :  { %v358_v23 = vpop.eup %357 }
  0xec   :  { %v105_v24 = vadd.f32 1.0, %v358_v23 }
  0xed   :  { %v360_v25 = vpop.eup %359 }
  0xee   :  { %v106_v28 = vadd.f32 1.0, %v360_v25  ;;  %v107_v29 = vmul.f32 %v105_v24, %v99_v26 }
  0xf0   :  { %v108_v30 = vmul.f32 %v106_v28, %v100_v27 }
  0xf2   :  { %v109_v31 = vpack.c.bf16 %v108_v30, %v107_v29 }
  0xf4   :  { %339 = vmatmul.mubr.bf16.vlgmr.msra.gmra.mrb[0].mxu1 %v109_v31 }
 0x1c7   :  { %v215_v33 = vpop.f32.mrb[0].mxu1 }
 0x1c8   :  { %v216_v34 = vadd.f32 %v291_v32, %v215_v33  ;;  %v340_v35 = vpop.f32.mrb[1].mxu1 }
 0x1c9   :  { %v218_v36 = vpop.f32.mrb[2].mxu1 }
 0x1ca   :  { %v219_v37 = vadd.f32 %v291_v32, %v218_v36  ;;  %v341_v38 = vpop.f32.mrb[3].mxu1  ;;  %v222_v39 = vadd.f32 %v216_v34, %v28_v3 }
 0x1cc   :  { %v224_v40 = vsel %vm54_vm1, %v222_v39, 0.0  ;;  %v223_v41 = vadd.f32 %v219_v37, %v29_v4 }
 0x1cd   :  { %225 = vadd.xlane.f32.xlu0 %v224_v40 }
 0x1ce   :  { %v227_v42 = vsel %vm54_vm1, %v223_v41, 0.0 }
 0x1d1   :  { %228 = vadd.xlane.f32.xlu0 %v227_v42 }
 0x25a   :  { %v226_v43 = vpop.xlane.xlu0 %225 }
 0x25b   :  { %v231_v44 = vmul.f32 0.03125, %v226_v43 }
 0x25d   :  { %v233_v45 = vsub.f32 %v222_v39, %v231_v44 }
 0x25e   :  { %v229_v46 = vpop.xlane.xlu0 %228 }
 0x25f   :  { %v232_v47 = vmul.f32 0.03125, %v229_v46  ;;  %v235_v48 = vmul.f32 %v233_v45, %v233_v45 }
 0x261   :  { %v234_v49 = vsub.f32 %v223_v41, %v232_v47  ;;  %v237_v50 = vsel %vm54_vm1, %v235_v48, 0.0 }
 0x262   :  { %238 = vadd.xlane.f32.xlu1 %v237_v50 }
 0x263   :  { %v236_v51 = vmul.f32 %v234_v49, %v234_v49 }
 0x265   :  { %v240_v52 = vsel %vm54_vm1, %v236_v51, 0.0 }
 0x266   :  { %241 = vadd.xlane.f32.xlu1 %v240_v52 }
 0x2ef   :  { %v239_v53 = vpop.xlane.xlu1 %238 }
 0x2f0   :  { %v243_v54 = vmul.f32 0.03125, %v239_v53 }
 0x2f2   :  { %v245_v55 = vadd.f32 1e-12, %v243_v54 }
 0x2f3   :  { %v242_v56 = vpop.xlane.xlu1 %241 }
 0x2f4   :  { %361 = vrsqrt.f32 %v245_v55  ;;  %v244_v57 = vmul.f32 0.03125, %v242_v56 }
 0x2f6   :  { %v246_v58 = vadd.f32 1e-12, %v244_v57 }
 0x2f8   :  { %363 = vrsqrt.f32 %v246_v58 }
 0x2fe   :  { %v362_v59 = vpop.eup %361 }
 0x2ff   :  { %v249_v61 = vmul.f32 %v362_v59, %v233_v45 }
 0x301   :  { %v258_v63 = vmul.f32 %v300_v60, %v249_v61 }
 0x302   :  { %v364_v0 = vpop.eup %363 }
 0x303   :  { %v250_v1 = vmul.f32 %v364_v0, %v234_v49  ;;  %v267_v2 = vadd.f32 %v301_v62, %v258_v63 }
 0x305   :  { %v259_v3 = vmul.f32 %v300_v60, %v250_v1  ;;  %269 = vst.msk [vmem:[#allocation2] sm:$0xff] %vm54_vm1, %v267_v2 }
 0x307   :  { %v268_v4 = vadd.f32 %v301_v62, %v259_v3 }
 0x309   :  { %270 = vst.msk [vmem:[#allocation2 + $0x8] sm:$0xff] %vm54_vm1, %v268_v4 }
 0x30a   :  { %376 = shalt.err (!%p373_p4)
}
 0x30b   :  { %s377_s8 = scalar_lea.hbm %s508_s7, 256 }
 0x30c   :  { %p378_p5 = scmp.ne.s32.totalorder %s508_s7, %s377_s8  ;;  %p381_p6 = scmp.lt.u32.totalorder %s377_s8, %s508_s7 }
 0x30e   :  { %p383_p7 = pnand %p381_p6, %p378_p5 }
 0x310   :  { %386 = shalt.err (!%p383_p7)
}
 0x311   :  { %s392_s0 = smov 128   ;;  %s393_s12 = smov 8  }
 0x312   :  { %282 = dma.vmem_to_hbm [thread:$0]  %s277_s29, 256, %s508_s7, [#allocation3], %s392_s0, %s392_s0, %s393_s12  }
 0x313   :  { %387 = dma.done.wait [#allocation3], 256  }
 0x314   :  { %388 = vsyncadd [#allocation3], 4294967040 }
 0x315   :  { %286 = vsyncpa [#allocation3], 1 }

// kernel: tpu_custom_call.1
= control target key start
LH: loop header
LB: loop body
LE: loop exit
PB: predicated region body
PF: predicated region fallthrough
CT: control target
= control target key end

     0   :  { %v389_v1 = vmov 0.0   ;;  %vm390_vm0 = vmmov 0   ;;  %vm54_vm1 = vcmask 261120   ;;  %s501_s0 = inlined_call_operand.vmem [shape: f32[16,32], index: 0, kind: input, shape index: {}]   ;;  %s502_s1 = inlined_call_operand.vmem [shape: bf16[32,128], index: 1, kind: input, shape index: {}]   ;;  %s503_s2 = inlined_call_operand.vmem [shape: f32[1,128], index: 2, kind: input, shape index: {}]   ;;  %s504_s3 = inlined_call_operand.vmem [shape: bf16[128,32], index: 3, kind: input, shape index: {}]   ;;  %s505_s4 = inlined_call_operand.vmem [shape: f32[1,32], index: 4, kind: input, shape index: {}]   ;;  %s506_s5 = inlined_call_operand.vmem [shape: f32[1,32], index: 5, kind: input, shape index: {}]   ;;  %s507_s6 = inlined_call_operand.vmem [shape: f32[1,32], index: 6, kind: input, shape index: {}]   ;;  %s508_s7 = inlined_call_operand.hbm [shape: f32[16,32], index: 7, kind: output, shape index: {}]  }
   0x1   :  { %v347_v0 = vld [vmem:[%s502_s1] sm:$0xff]   ;;  %314 = vmatprep.subr.bf16.mxu0 %v389_v1  ;;  %v348_v2 = vld [vmem:[%s502_s1 + $0x8] sm:$0xff]   ;;  %322 = vmatprep.subr.bf16.mxu1 %v389_v1 }
   0x2   :  { %315 = vmatpush3.bf16.msra.mxu0 %v347_v0  ;;  %318 = vmatprep.mubr.msk.bf16.mxu0 %vm390_vm0, %v389_v1  ;;  %v28_v3 = vld [vmem:[%s501_s0] sm:$0xff]  ;;  %v29_v4 = vld [vmem:[%s501_s0 + $0x8] sm:$0xff] }
   0x3   :  { %316 = vmatprep.subr.bf16.mxu0 %v389_v1  ;;  %v349_v5 = vld [vmem:[%s504_s3] sm:$0xff]   ;;  %338 = vmatprep.mubr.msk.bf16.mxu1 %vm390_vm0, %v389_v1  ;;  %v350_v6 = vld [vmem:[%s504_s3 + $0x8] sm:$0xff]   ;;  %v30_v7 = vpack.c.bf16 %v29_v4, %v28_v3 }
   0x4   :  { %323 = vmatpush3.bf16.msra.mxu1 %v349_v5 }
   0x5   :  { %324 = vmatprep.subr.bf16.mxu1 %v389_v1 }
   0x6   :  { %317 = vmatpush3.bf16.msra.mxu0 %v348_v2 }
   0x8   :  { %325 = vmatpush3.bf16.msra.mxu1 %v350_v6 }
   0x9   :  { %319 = vmatmul.mubr.msk.bf16.vlgmr.msra.gmra.mrb[0].mxu0 %vm54_vm1, %v30_v7 }
   0xa   :  { %12 = vsyncpa [#allocation3], 0  ;;  %326 = vmatprep.subr.bf16.mxu1 %v389_v1  ;;  %v351_v8 = vld [vmem:[%s504_s3 + $0x10] sm:$0xff]   ;;  %v352_v9 = vld [vmem:[%s504_s3 + $0x18] sm:$0xff]   ;;  %s391_s28 = smov [#allocation2]  }
   0xb   :  { %v353_v10 = vld [vmem:[%s504_s3 + $0x20] sm:$0xff]   ;;  %v354_v11 = vld [vmem:[%s504_s3 + $0x28] sm:$0xff]   ;;  %v355_v12 = vld [vmem:[%s504_s3 + $0x30] sm:$0xff]   ;;  %s276_s29 = sshll.u32 %s391_s28, 4  ;;  %s277_s29 = int_to_ptr.vmem [resolvable:$true] %s276_s29 }
   0xc   :  { %327 = vmatpush3.bf16.msra.mxu1 %v351_v8  ;;  %v356_v13 = vld [vmem:[%s504_s3 + $0x38] sm:$0xff]   ;;  %v287_v14 = vld [vmem:[%s503_s2] ss:$0 sm:$0xff]  ;;  %s365_s30 = scalar_lea.vmem %s277_s29, 256  ;;  %p370_p1 = scmp.lt.s32.totalorder %s277_s29, %s277_s29 }
   0xd   :  { %328 = vmatprep.subr.bf16.mxu1 %v389_v1  ;;  %v291_v32 = vld [vmem:[%s505_s4] ss:$0 sm:$0xff]  ;;  %p366_p0 = scmp.ne.s32.totalorder %s277_s29, %s365_s30  ;;  %p371_p2 = scmp.lt.s32.totalorder %s365_s30, %s365_s30 }
   0xe   :  { %v300_v60 = vld [vmem:[%s506_s5] ss:$0 sm:$0xff] }
   0xf   :  { %v301_v62 = vld [vmem:[%s507_s6] ss:$0 sm:$0xff]  ;;  %p372_p3 = por %p371_p2, %p370_p1 }
  0x10   :  { %329 = vmatpush3.bf16.msra.mxu1 %v352_v9 }
  0x11   :  { %330 = vmatprep.subr.bf16.mxu1 %v389_v1  ;;  %p373_p4 = pnand %p372_p3, %p366_p0 }
  0x14   :  { %331 = vmatpush3.bf16.msra.mxu1 %v353_v10 }
  0x15   :  { %332 = vmatprep.subr.bf16.mxu1 %v389_v1 }
  0x18   :  { %333 = vmatpush3.bf16.msra.mxu1 %v354_v11 }
  0x19   :  { %334 = vmatprep.subr.bf16.mxu1 %v389_v1 }
  0x1c   :  { %335 = vmatpush3.bf16.msra.mxu1 %v355_v12 }
  0x1d   :  { %336 = vmatprep.subr.bf16.mxu1 %v389_v1 }
  0x20   :  { %337 = vmatpush3.bf16.msra.mxu1 %v356_v13 }
  0xdc   :  { %v92_v15 = vpop.f32.mrb[0].mxu0 }
  0xdd   :  { %v93_v16 = vadd.f32 %v287_v14, %v92_v15  ;;  %v320_v17 = vpop.f32.mrb[1].mxu0 }
  0xde   :  { %v95_v18 = vpop.f32.mrb[2].mxu0 }
  0xdf   :  { %v101_v19 = vmul.f32 0.70710677, %v93_v16  ;;  %v96_v20 = vadd.f32 %v287_v14, %v95_v18  ;;  %v321_v21 = vpop.f32.mrb[3].mxu0  ;;  %v99_v26 = vmul.f32 0.5, %v93_v16 }
  0xe1   :  { %357 = verf.f32 %v101_v19  ;;  %v102_v22 = vmul.f32 0.70710677, %v96_v20  ;;  %v100_v27 = vmul.f32 0.5, %v96_v20 }
  0xe3   :  { %359 = verf.f32 %v102_v22 }
  0xeb   :  { %v358_v23 = vpop.eup %357 }
  0xec   :  { %v105_v24 = vadd.f32 1.0, %v358_v23 }
  0xed   :  { %v360_v25 = vpop.eup %359 }
  0xee   :  { %v106_v28 = vadd.f32 1.0, %v360_v25  ;;  %v107_v29 = vmul.f32 %v105_v24, %v99_v26 }
  0xf0   :  { %v108_v30 = vmul.f32 %v106_v28, %v100_v27 }
  0xf2   :  { %v109_v31 = vpack.c.bf16 %v108_v30, %v107_v29 }
  0xf4   :  { %339 = vmatmul.mubr.bf16.vlgmr.msra.gmra.mrb[0].mxu1 %v109_v31 }
 0x1c7   :  { %v215_v33 = vpop.f32.mrb[0].mxu1 }
 0x1c8   :  { %v216_v34 = vadd.f32 %v291_v32, %v215_v33  ;;  %v340_v35 = vpop.f32.mrb[1].mxu1 }
 0x1c9   :  { %v218_v36 = vpop.f32.mrb[2].mxu1 }
 0x1ca   :  { %v219_v37 = vadd.f32 %v291_v32, %v218_v36  ;;  %v341_v38 = vpop.f32.mrb[3].mxu1  ;;  %v222_v39 = vadd.f32 %v216_v34, %v28_v3 }
 0x1cc   :  { %v224_v40 = vsel %vm54_vm1, %v222_v39, 0.0  ;;  %v223_v41 = vadd.f32 %v219_v37, %v29_v4 }
 0x1cd   :  { %225 = vadd.xlane.f32.xlu0 %v224_v40 }
 0x1ce   :  { %v227_v42 = vsel %vm54_vm1, %v223_v41, 0.0 }
 0x1d1   :  { %228 = vadd.xlane.f32.xlu0 %v227_v42 }
 0x25a   :  { %v226_v43 = vpop.xlane.xlu0 %225 }
 0x25b   :  { %v231_v44 = vmul.f32 0.03125, %v226_v43 }
 0x25d   :  { %v233_v45 = vsub.f32 %v222_v39, %v231_v44 }
 0x25e   :  { %v229_v46 = vpop.xlane.xlu0 %228 }
 0x25f   :  { %v232_v47 = vmul.f32 0.03125, %v229_v46  ;;  %v235_v48 = vmul.f32 %v233_v45, %v233_v45 }
 0x261   :  { %v234_v49 = vsub.f32 %v223_v41, %v232_v47  ;;  %v237_v50 = vsel %vm54_vm1, %v235_v48, 0.0 }
 0x262   :  { %238 = vadd.xlane.f32.xlu1 %v237_v50 }
 0x263   :  { %v236_v51 = vmul.f32 %v234_v49, %v234_v49 }
 0x265   :  { %v240_v52 = vsel %vm54_vm1, %v236_v51, 0.0 }
 0x266   :  { %241 = vadd.xlane.f32.xlu1 %v240_v52 }
 0x2ef   :  { %v239_v53 = vpop.xlane.xlu1 %238 }
 0x2f0   :  { %v243_v54 = vmul.f32 0.03125, %v239_v53 }
 0x2f2   :  { %v245_v55 = vadd.f32 1e-12, %v243_v54 }
 0x2f3   :  { %v242_v56 = vpop.xlane.xlu1 %241 }
 0x2f4   :  { %361 = vrsqrt.f32 %v245_v55  ;;  %v244_v57 = vmul.f32 0.03125, %v242_v56 }
 0x2f6   :  { %v246_v58 = vadd.f32 1e-12, %v244_v57 }
 0x2f8   :  { %363 = vrsqrt.f32 %v246_v58 }
 0x2fe   :  { %v362_v59 = vpop.eup %361 }
 0x2ff   :  { %v249_v61 = vmul.f32 %v362_v59, %v233_v45 }
 0x301   :  { %v258_v63 = vmul.f32 %v300_v60, %v249_v61 }
 0x302   :  { %v364_v0 = vpop.eup %363 }
 0x303   :  { %v250_v1 = vmul.f32 %v364_v0, %v234_v49  ;;  %v267_v2 = vadd.f32 %v301_v62, %v258_v63 }
 0x305   :  { %v259_v3 = vmul.f32 %v300_v60, %v250_v1  ;;  %269 = vst.msk [vmem:[#allocation2] sm:$0xff] %vm54_vm1, %v267_v2 }
 0x307   :  { %v268_v4 = vadd.f32 %v301_v62, %v259_v3 }
 0x309   :  { %270 = vst.msk [vmem:[#allocation2 + $0x8] sm:$0xff] %vm54_vm1, %v268_v4 }
 0x30a   :  { %376 = shalt.err (!%p373_p4)
}
 0x30b   :  { %s377_s8 = scalar_lea.hbm %s508_s7, 256 }
 0x30c   :  { %p378_p5 = scmp.ne.s32.totalorder %s508_s7, %s377_s8  ;;  %p381_p6 = scmp.lt.u32.totalorder %s377_s8, %s508_s7 }
 0x30e   :  { %p383_p7 = pnand %p381_p6, %p378_p5 }
 0x310   :  { %386 = shalt.err (!%p383_p7)
}
 0x311   :  { %s392_s0 = smov 128   ;;  %s393_s12 = smov 8  }
 0x312   :  { %282 = dma.vmem_to_hbm [thread:$0]  %s277_s29, 256, %s508_s7, [#allocation3], %s392_s0, %s392_s0, %s393_s12  }
 0x313   :  { %387 = dma.done.wait [#allocation3], 256  }
 0x314   :  { %388 = vsyncadd [#allocation3], 4294967040 }
 0x315   :  { %286 = vsyncpa [#allocation3], 1 }

</bundles_post_ra>
